<compile_context>
chip_gen: v7x
topology: tpu7x:2x2x1
jax: 0.10.0
libtpu: 0.0.40
codegen_flags: <defaults>
</compile_context>

<pallas_src>
import jax
import jax.numpy as jnp
from jax import lax
from jax.experimental import pallas as pl
from jax.experimental.pallas import tpu as pltpu

EPS = 1e-5


def _make_output_layer_kernel(apply_bn_relu: bool):
    def kernel(x_ref, g_ref, b_ref, w_ref, fcb_ref, o_ref):
        """One channel-block of the output head.

        x_ref  : (N, Cb, HW)   input block, lane axis = HW (spatial, lane-dense)
        g_ref  : (1, Cb, 1)    BN gamma
        b_ref  : (1, Cb, 1)    BN beta
        w_ref  : (Cb, NC)      fc weight slice (already transposed, bf16)
        fcb_ref: (1, NC)       fc bias
        o_ref  : (N, NC)       output logits; resident accumulator across grid
        """
        c = pl.program_id(0)

        @pl.when(c == 0)
        def _init():
            o_ref[...] = jnp.zeros_like(o_ref)

        N, Cb, HW = x_ref.shape
        x = x_ref[...]                                   # (N, Cb, HW) f32

        if apply_bn_relu:
            # Per-channel batch statistics over (N, HW) -- exact, since every
            # grid step sees the full batch & spatial extent for its channels.
            inv_cnt = 1.0 / (N * HW)
            s = jnp.sum(jnp.sum(x, axis=2, keepdims=True), axis=0, keepdims=True)
            ss = jnp.sum(jnp.sum(x * x, axis=2, keepdims=True), axis=0, keepdims=True)
            mean = s * inv_cnt                           # (1, Cb, 1)
            var = ss * inv_cnt - mean * mean             # biased variance
            scale = g_ref[...] * lax.rsqrt(var + EPS)    # (1, Cb, 1)
            shift = b_ref[...] - mean * scale
            x = jnp.maximum(x * scale + shift, 0.0)      # BN + ReLU, f32 on VPU

        # Global average pool over the lane (spatial) axis -> (N, Cb)
        pooled = jnp.sum(x, axis=2) * (1.0 / HW)

        # Partial FC contribution of this channel block (bf16 in, f32 acc).
        o_ref[...] += jnp.dot(pooled.astype(jnp.bfloat16), w_ref[...],
                              preferred_element_type=jnp.float32)

        @pl.when(c == pl.num_programs(0) - 1)
        def _finalize():
            o_ref[...] = o_ref[...] + fcb_ref[...]

    return kernel


def _pick_cblk(C):
    """Channel block size: full C for small nets, else a 128-multiple divisor."""
    if C <= 1024:
        return C
    for cb in (1024, 512, 256, 128):
        if C % cb == 0:
            return cb
    return C


def output_layer_pallas(x_nchw, gamma, beta, fc_w, fc_b, resnet_version=2):
    """x_nchw: (N, C, H, W) f32. fc_w: (num_classes, C) torch layout.

    Returns (N, num_classes) f32 logits.
    """
    N, C, H, W = x_nchw.shape
    HW = H * W
    num_classes = fc_w.shape[0]

    # Free (contiguous) reshape: lane axis becomes H*W. No transposes.
    x3 = x_nchw.reshape(N, C, HW)
    g3 = gamma.reshape(1, C, 1).astype(jnp.float32)
    b3 = beta.reshape(1, C, 1).astype(jnp.float32)
    wt = jnp.transpose(fc_w, (1, 0)).astype(jnp.bfloat16)   # (C, num_classes)
    fb2 = fc_b.reshape(1, num_classes).astype(jnp.float32)

    c_blk = _pick_cblk(C)
    grid = (C // c_blk,)

    kernel = _make_output_layer_kernel(resnet_version == 2)

    out = pl.pallas_call(
        kernel,
        out_shape=jax.ShapeDtypeStruct((N, num_classes), jnp.float32),
        grid_spec=pltpu.PrefetchScalarGridSpec(
            num_scalar_prefetch=0,
            grid=grid,
            in_specs=[
                pl.BlockSpec((N, c_blk, HW), lambda c: (0, c, 0)),   # x
                pl.BlockSpec((1, c_blk, 1), lambda c: (0, c, 0)),    # gamma
                pl.BlockSpec((1, c_blk, 1), lambda c: (0, c, 0)),    # beta
                pl.BlockSpec((c_blk, num_classes), lambda c: (c, 0)),# fc weight
                pl.BlockSpec((1, num_classes), lambda c: (0, 0)),    # fc bias
            ],
            out_specs=pl.BlockSpec((N, num_classes), lambda c: (0, 0)),
        ),
        compiler_params=pltpu.CompilerParams(
            dimension_semantics=("arbitrary",)),  # output accumulates over c
    )(x3, g3, b3, wt, fb2)

    return out


# ---------------- pure-JAX reference (PyTorch semantics, NCHW) ----------------
def output_layer_ref(x, gamma, beta, fc_w, fc_b, resnet_version=2):
    if resnet_version == 2:
        mean = x.mean(axis=(0, 2, 3), keepdims=True)
        var = ((x - mean) ** 2).mean(axis=(0, 2, 3), keepdims=True)
        x = (x - mean) * lax.rsqrt(var + EPS) * gamma.reshape(1, -1, 1, 1) \
            + beta.reshape(1, -1, 1, 1)
        x = jnp.maximum(x, 0.0)
    pooled = x.mean(axis=(2, 3))                       # (N, C)
    return pooled @ fc_w.T + fc_b                      # (N, num_classes)


if __name__ == "__main__":
    filters, num_classes = 4, 10
    N, H, W = 2, 16, 16
    resnet_version = 2

    key = jax.random.PRNGKey(0)
    ks = jax.random.split(key, 5)

    x = jax.random.normal(ks[0], (N, filters, H, W), jnp.float32)
    gamma = 1.0 + 0.1 * jax.random.normal(ks[1], (filters,), jnp.float32)
    beta = 0.1 * jax.random.normal(ks[2], (filters,), jnp.float32)
    # torch nn.Linear weight layout: (out_features, in_features)
    fc_w = 0.1 * jax.random.normal(ks[3], (num_classes, filters), jnp.float32)
    fc_b = 0.1 * jax.random.normal(ks[4], (num_classes,), jnp.float32)

    out = output_layer_pallas(x, gamma, beta, fc_w, fc_b,
                              resnet_version=resnet_version)
    out = jax.block_until_ready(out)

    ref = output_layer_ref(x, gamma, beta, fc_w, fc_b,
                           resnet_version=resnet_version)
    ref = jax.block_until_ready(ref)

    assert out.shape == (N, num_classes)
    assert jnp.allclose(out, ref, rtol=1e-2, atol=1e-2), \
        f"max abs diff = {jnp.max(jnp.abs(out - ref))}"

    print("KERNEL_OK")
</pallas_src>

<mosaic_0001>
module attributes {stable_mosaic.version = 11 : i64} {
  func.func @kernel(%arg0: i32, %arg1: memref<2x4x256xf32, #tpu.memory_space<vmem>>, %arg2: memref<1x4x1xf32, #tpu.memory_space<vmem>>, %arg3: memref<1x4x1xf32, #tpu.memory_space<vmem>>, %arg4: memref<4x10xbf16, #tpu.memory_space<vmem>>, %arg5: memref<1x10xf32, #tpu.memory_space<vmem>>, %arg6: memref<2x10xf32, #tpu.memory_space<vmem>>) attributes {dimension_semantics = [#tpu.dimension_semantics<arbitrary>], iteration_bounds = array<i64: 1>, scalar_prefetch = 0 : i64, scratch_operands = 0 : i64, tpu.core_type = #tpu.core_type<tc>, window_params = [{transform_indices = @transform_0, window_bounds = array<i64: 2, 4, 256>}, {transform_indices = @transform_1, window_bounds = array<i64: 1, 4, 1>}, {transform_indices = @transform_2, window_bounds = array<i64: 1, 4, 1>}, {transform_indices = @transform_3, window_bounds = array<i64: 4, 10>}, {pipeline_mode = #tpu.pipeline_mode<synchronous>, transform_indices = @transform_4, window_bounds = array<i64: 1, 10>}, {pipeline_mode = #tpu.pipeline_mode<synchronous>, transform_indices = @transform_5, window_bounds = array<i64: 2, 10>}]} {
    %c0_i32 = arith.constant 0 : i32
    %0 = arith.cmpi eq, %arg0, %c0_i32 : i32
    %1 = arith.extui %0 : i1 to i32
    %c0_i32_0 = arith.constant 0 : i32
    %2 = arith.cmpi ne, %1, %c0_i32_0 : i32
    scf.if %2 {
      %cst_27 = arith.constant 0.000000e+00 : f32
      %45 = vector.broadcast %cst_27 : f32 to vector<2x10xf32>
      %c0_28 = arith.constant 0 : index
      %c0_29 = arith.constant 0 : index
      %46 = vector.load %arg6[%c0_28, %c0_29] : memref<2x10xf32, #tpu.memory_space<vmem>>, vector<2x10xf32>
      tpu.vector_store %arg6[%c0_28, %c0_29], %45 {strides = array<i32>} : memref<2x10xf32, #tpu.memory_space<vmem>>, vector<2x10xf32>,
    } else {
    }
    %c0 = arith.constant 0 : index
    %c0_1 = arith.constant 0 : index
    %c0_2 = arith.constant 0 : index
    %3 = vector.load %arg1[%c0, %c0_1, %c0_2] : memref<2x4x256xf32, #tpu.memory_space<vmem>>, vector<2x4x256xf32>
    %cst = arith.constant dense<0.000000e+00> : vector<2x4xf32>
    %4 = vector.multi_reduction <add>, %3, %cst [2] : vector<2x4x256xf32> to vector<2x4xf32>
    %5 = vector.shape_cast %4 : vector<2x4xf32> to vector<2x4x1xf32>
    %cst_3 = arith.constant dense<0.000000e+00> : vector<4x1xf32>
    %6 = vector.multi_reduction <add>, %5, %cst_3 [0] : vector<2x4x1xf32> to vector<4x1xf32>
    %7 = vector.shape_cast %6 : vector<4x1xf32> to vector<1x4x1xf32>
    %8 = arith.mulf %3, %3 : vector<2x4x256xf32>
    %cst_4 = arith.constant dense<0.000000e+00> : vector<2x4xf32>
    %9 = vector.multi_reduction <add>, %8, %cst_4 [2] : vector<2x4x256xf32> to vector<2x4xf32>
    %10 = vector.shape_cast %9 : vector<2x4xf32> to vector<2x4x1xf32>
    %cst_5 = arith.constant dense<0.000000e+00> : vector<4x1xf32>
    %11 = vector.multi_reduction <add>, %10, %cst_5 [0] : vector<2x4x1xf32> to vector<4x1xf32>
    %12 = vector.shape_cast %11 : vector<4x1xf32> to vector<1x4x1xf32>
    %cst_6 = arith.constant 0.001953125 : f32
    %13 = vector.broadcast %cst_6 : f32 to vector<1x4x1xf32>
    %14 = arith.mulf %7, %13 : vector<1x4x1xf32>
    %cst_7 = arith.constant 0.001953125 : f32
    %15 = vector.broadcast %cst_7 : f32 to vector<1x4x1xf32>
    %16 = arith.mulf %12, %15 : vector<1x4x1xf32>
    %17 = arith.mulf %14, %14 : vector<1x4x1xf32>
    %18 = arith.subf %16, %17 : vector<1x4x1xf32>
    %c0_8 = arith.constant 0 : index
    %c0_9 = arith.constant 0 : index
    %c0_10 = arith.constant 0 : index
    %19 = vector.load %arg2[%c0_8, %c0_9, %c0_10] : memref<1x4x1xf32, #tpu.memory_space<vmem>>, vector<1x4x1xf32>
    %cst_11 = arith.constant 9.99999974E-6 : f32
    %20 = vector.broadcast %cst_11 : f32 to vector<1x4x1xf32>
    %21 = arith.addf %18, %20 : vector<1x4x1xf32>
    %22 = math.rsqrt %21 : vector<1x4x1xf32>
    %23 = arith.mulf %19, %22 : vector<1x4x1xf32>
    %c0_12 = arith.constant 0 : index
    %c0_13 = arith.constant 0 : index
    %c0_14 = arith.constant 0 : index
    %24 = vector.load %arg3[%c0_12, %c0_13, %c0_14] : memref<1x4x1xf32, #tpu.memory_space<vmem>>, vector<1x4x1xf32>
    %25 = arith.mulf %14, %23 : vector<1x4x1xf32>
    %26 = arith.subf %24, %25 : vector<1x4x1xf32>
    %27 = vector.broadcast %23 : vector<1x4x1xf32> to vector<2x4x256xf32>
    %28 = arith.mulf %3, %27 : vector<2x4x256xf32>
    %29 = vector.broadcast %26 : vector<1x4x1xf32> to vector<2x4x256xf32>
    %30 = arith.addf %28, %29 : vector<2x4x256xf32>
    %cst_15 = arith.constant 0.000000e+00 : f32
    %31 = vector.broadcast %cst_15 : f32 to vector<2x4x256xf32>
    %32 = arith.maximumf %30, %31 : vector<2x4x256xf32>
    %cst_16 = arith.constant dense<0.000000e+00> : vector<2x4xf32>
    %33 = vector.multi_reduction <add>, %32, %cst_16 [2] : vector<2x4x256xf32> to vector<2x4xf32>
    %cst_17 = arith.constant 3.906250e-03 : f32
    %34 = vector.broadcast %cst_17 : f32 to vector<2x4xf32>
    %35 = arith.mulf %33, %34 : vector<2x4xf32>
    %c0_18 = arith.constant 0 : index
    %c0_19 = arith.constant 0 : index
    %36 = vector.load %arg6[%c0_18, %c0_19] : memref<2x10xf32, #tpu.memory_space<vmem>>, vector<2x10xf32>
    %37 = arith.truncf %35 : vector<2x4xf32> to vector<2x4xbf16>
    %c0_20 = arith.constant 0 : index
    %c0_21 = arith.constant 0 : index
    %38 = vector.load %arg4[%c0_20, %c0_21] : memref<4x10xbf16, #tpu.memory_space<vmem>>, vector<4x10xbf16>
    %cst_22 = arith.constant dense<0.000000e+00> : vector<2x10xf32>
    %39 = tpu.matmul %37, %38, %cst_22 {dimension_numbers = #tpu.dot_dimension_numbers<[1], [0], [0], [1], [0, 0, 1, 1], [], []>} : vector<2x4xbf16>, vector<4x10xbf16>, vector<2x10xf32> -> vector<2x10xf32>
    %40 = arith.addf %36, %39 : vector<2x10xf32>
    %c0_23 = arith.constant 0 : index
    %c0_24 = arith.constant 0 : index
    %41 = vector.load %arg6[%c0_23, %c0_24] : memref<2x10xf32, #tpu.memory_space<vmem>>, vector<2x10xf32>
    tpu.vector_store %arg6[%c0_23, %c0_24], %40 {strides = array<i32>} : memref<2x10xf32, #tpu.memory_space<vmem>>, vector<2x10xf32>,
    %c0_i32_25 = arith.constant 0 : i32
    %42 = arith.cmpi eq, %arg0, %c0_i32_25 : i32
    %43 = arith.extui %42 : i1 to i32
    %c0_i32_26 = arith.constant 0 : i32
    %44 = arith.cmpi ne, %43, %c0_i32_26 : i32
    scf.if %44 {
      %c0_27 = arith.constant 0 : index
      %c0_28 = arith.constant 0 : index
      %45 = vector.load %arg6[%c0_27, %c0_28] : memref<2x10xf32, #tpu.memory_space<vmem>>, vector<2x10xf32>
      %c0_29 = arith.constant 0 : index
      %c0_30 = arith.constant 0 : index
      %46 = vector.load %arg5[%c0_29, %c0_30] : memref<1x10xf32, #tpu.memory_space<vmem>>, vector<1x10xf32>
      %47 = vector.broadcast %46 : vector<1x10xf32> to vector<2x10xf32>
      %48 = arith.addf %45, %47 : vector<2x10xf32>
      %c0_31 = arith.constant 0 : index
      %c0_32 = arith.constant 0 : index
      %49 = vector.load %arg6[%c0_31, %c0_32] : memref<2x10xf32, #tpu.memory_space<vmem>>, vector<2x10xf32>
      tpu.vector_store %arg6[%c0_31, %c0_32], %48 {strides = array<i32>} : memref<2x10xf32, #tpu.memory_space<vmem>>, vector<2x10xf32>,
    } else {
    }
    return
  }
  func.func @transform_0(%arg0: i32) -> (i32, i32, i32) {
    %c0_i32 = arith.constant 0 : i32
    %c0_i32_0 = arith.constant 0 : i32
    %c0_i32_1 = arith.constant 0 : i32
    return %c0_i32, %arg0, %c0_i32_0 : i32, i32, i32
  }
  func.func @transform_1(%arg0: i32) -> (i32, i32, i32) {
    %c0_i32 = arith.constant 0 : i32
    %c0_i32_0 = arith.constant 0 : i32
    %c0_i32_1 = arith.constant 0 : i32
    return %c0_i32, %arg0, %c0_i32_0 : i32, i32, i32
  }
  func.func @transform_2(%arg0: i32) -> (i32, i32, i32) {
    %c0_i32 = arith.constant 0 : i32
    %c0_i32_0 = arith.constant 0 : i32
    %c0_i32_1 = arith.constant 0 : i32
    return %c0_i32, %arg0, %c0_i32_0 : i32, i32, i32
  }
  func.func @transform_3(%arg0: i32) -> (i32, i32) {
    %c0_i32 = arith.constant 0 : i32
    %c0_i32_0 = arith.constant 0 : i32
    return %arg0, %c0_i32 : i32, i32
  }
  func.func @transform_4(%arg0: i32) -> (i32, i32) {
    %c0_i32 = arith.constant 0 : i32
    %c0_i32_0 = arith.constant 0 : i32
    %c0_i32_1 = arith.constant 0 : i32
    return %c0_i32, %c0_i32_0 : i32, i32
  }
  func.func @transform_5(%arg0: i32) -> (i32, i32) {
    %c0_i32 = arith.constant 0 : i32
    %c0_i32_0 = arith.constant 0 : i32
    %c0_i32_1 = arith.constant 0 : i32
    return %c0_i32, %c0_i32_0 : i32, i32
  }
}

</mosaic_0001>

<bundles_post_ra>
// kernel: tpu_custom_call.1
= control target key start
LH: loop header
LB: loop body
LE: loop exit
PB: predicated region body
PF: predicated region fallthrough
CT: control target
= control target key end

     0   :  { %10 = vsyncpa [#allocation3], 0  ;;  %s409_s0 = inlined_call_operand.hbm [shape: f32[2,4,256], index: 0, kind: input, shape index: {}]   ;;  %s410_s1 = inlined_call_operand.vmem [shape: f32[1,4,1], index: 1, kind: input, shape index: {}]   ;;  %s411_s2 = inlined_call_operand.vmem [shape: f32[1,4,1], index: 2, kind: input, shape index: {}]   ;;  %s412_s3 = inlined_call_operand.vmem [shape: bf16[4,10], index: 3, kind: input, shape index: {}]   ;;  %s413_s4 = inlined_call_operand.vmem [shape: f32[1,10], index: 4, kind: input, shape index: {}]   ;;  %s414_s5 = inlined_call_operand.hbm [shape: f32[2,10], index: 5, kind: output, shape index: {}]  }
   0x1   :  { %11 = vsyncpa [#allocation4], 0  ;;  %s316_s18 = smov [#allocation2]   ;;  %s268_s22 = scalar_lea.hbm %s409_s0, 256 }
   0x2   :  { %s17_s19 = sshll.u32 %s316_s18, 4  ;;  %p269_p0 = scmp.ne.s32.totalorder %s409_s0, %s268_s22  ;;  %s18_s19 = int_to_ptr.vmem [resolvable:$true] %s17_s19 }
   0x3   :  { %p272_p1 = scmp.lt.u32.totalorder %s268_s22, %s409_s0 }
   0x5   :  { %p274_p2 = pnand %p272_p1, %p269_p0 }
   0x7   :  { %277 = shalt.err (!%p274_p2)
}
   0x8   :  { %s278_s27 = scalar_lea.vmem %s18_s19, 256  ;;  %p283_p4 = scmp.lt.s32.totalorder %s18_s19, %s18_s19 }
   0x9   :  { %p279_p3 = scmp.ne.s32.totalorder %s18_s19, %s278_s27  ;;  %p284_p5 = scmp.lt.s32.totalorder %s278_s27, %s278_s27 }
   0xb   :  { %p285_p6 = por %p284_p5, %p283_p4 }
   0xd   :  { %p286_p7 = pnand %p285_p6, %p279_p3 }
   0xf   :  { %289 = shalt.err (!%p286_p7)
}
  0x10   :  { %s317_s28 = smov 128   ;;  %s318_s29 = smov 8  }
  0x11   :  { %23 = dma.hbm_to_vmem [thread:$0]  %s409_s0, 256, %s18_s19, [#allocation3], %s317_s28, %s317_s28, %s318_s29  }
  0x12   :  { %312 = dma.done.wait [#allocation3], 256  }
  0x13   :  { %313 = vsyncadd [#allocation3], 4294967040  ;;  %vm50_vm0 = vcmask 1043456   ;;  %v42_v0 = vld [vmem:[#allocation2] sm:$0xff]  ;;  %v43_v1 = vld [vmem:[#allocation2 + $0x8] sm:$0xff]  ;;  %v319_v20 = vmov 0   ;;  %v103_v44 = vlaneseq }
  0x14   :  { %v46_v2 = vcombine.high %v42_v0, %v42_v0  ;;  %v51_v3 = vsel %vm50_vm0, %v42_v0, 0.0  ;;  %v64_v4 = vmul.f32 %v42_v0, %v42_v0  ;;  %v47_v5 = vcombine.high %v43_v1, %v43_v1  ;;  %262 = vset.pattern.permute.xlu0 %v319_v20  ;;  %263 = vset.pattern.permute.xlu1 %v319_v20  ;;  %v89_v36 = vld [vmem:[%s410_s1] sm:$0xf]  ;;  %s323_s11 = smov [#allocation5]  }
  0x15   :  { %v56_v6 = vsel %vm50_vm0, %v43_v1, 0.0  ;;  %v65_v7 = vmul.f32 %v43_v1, %v43_v1  ;;  %v93_v39 = vld [vmem:[%s411_s2] sm:$0xf]  ;;  %v320_v42 = vmov 839922192   ;;  %v104_v46 = vshrl.u32 %v103_v44, 7 }
  0x16   :  { %v52_v8 = vsel %vm50_vm0, %v46_v2, 0.0  ;;  %v68_v9 = vcombine.high %v64_v4, %v64_v4  ;;  %v72_v10 = vsel %vm50_vm0, %v64_v4, 0.0  ;;  %v57_v11 = vsel %vm50_vm0, %v47_v5, 0.0  ;;  %s235_s12 = sshll.u32 %s323_s11, 4  ;;  %s236_s12 = int_to_ptr.vmem [resolvable:$true] %s235_s12 }
  0x17   :  { %v53_v12 = vadd.f32 %v52_v8, %v51_v3  ;;  %v69_v13 = vcombine.high %v65_v7, %v65_v7  ;;  %v77_v15 = vsel %vm50_vm0, %v65_v7, 0.0  ;;  %v58_v17 = vadd.f32 %v57_v11, %v56_v6  ;;  %s290_s13 = scalar_lea.vmem %s236_s12, 32  ;;  %p295_p9 = scmp.lt.s32.totalorder %s236_s12, %s236_s12 }
  0x18   :  { %v73_v14 = vsel %vm50_vm0, %v68_v9, 0.0  ;;  %v101_v43 = vunpack.c.l.s4 %v320_v42  ;;  %vm169_vm1 = vcmask 1041408   ;;  %vm40_vm2 = vcmask 74752   ;;  %p291_p8 = scmp.ne.s32.totalorder %s236_s12, %s290_s13  ;;  %p296_p10 = scmp.lt.s32.totalorder %s290_s13, %s290_s13 }
  0x19   :  { %54 = vadd.xlane.f32.xlu0 %v53_v12  ;;  %v74_v16 = vadd.f32 %v73_v14, %v72_v10  ;;  %v78_v18 = vsel %vm50_vm0, %v69_v13, 0.0  ;;  %vm322_vm3 = vmmov 0   ;;  %v153_v5 = vand.u32 127, %v103_v44 }
  0x1a   :  { %v79_v19 = vadd.f32 %v78_v18, %v77_v15  ;;  %v102_v45 = vunpack.c.0.s8 %v101_v43  ;;  %vm162_vm4 = vcmask 1041409   ;;  %vm165_vm5 = vcmask 31744   ;;  %p297_p11 = por %p296_p10, %p295_p9 }
  0x1b   :  { %75 = vadd.xlane.f32.xlu1 %v74_v16  ;;  %v156_v10 = vsub.s32 %v153_v5, %v104_v46 }
  0x1c   :  { %v105_v47 = vsub.s32 %v102_v45, %v104_v46  ;;  %p298_p12 = pnand %p297_p11, %p291_p8 }
  0x1d   :  { %59 = vadd.xlane.f32.xlu0 %v58_v17 }
  0x1f   :  { %80 = vadd.xlane.f32.xlu1 %v79_v19 }
  0xa6   :  { %v55_v21 = vpop.xlane.xlu0 %54 }
  0xa7   :  { %v61_v24 = vsel %vm50_vm0, %v55_v21, 0.0 }
  0xa8   :  { %v76_v22 = vpop.xlane.xlu1 %75 }
  0xa9   :  { %v82_v28 = vsel %vm50_vm0, %v76_v22, 0.0 }
  0xaa   :  { %v60_v23 = vpop.xlane.xlu0 %59 }
  0xab   :  { %v62_v25 = vsel %vm50_vm0, %v60_v23, 0.0 }
  0xac   :  { %v63_v26 = vadd.f32 %v62_v25, %v61_v24  ;;  %v81_v27 = vpop.xlane.xlu1 %80  ;;  %v245_v25 = vld [vmem:[%s413_s4] ss:$0 sm:$0xff] }
  0xad   :  { %v83_v29 = vsel %vm50_vm0, %v81_v27, 0.0 }
  0xae   :  { %v85_v30 = vmul.f32 0.001953125, %v63_v26  ;;  %v84_v31 = vadd.f32 %v83_v29, %v82_v28 }
  0xb0   :  { %v87_v32 = vmul.f32 %v85_v30, %v85_v30  ;;  %v86_v33 = vmul.f32 0.001953125, %v84_v31 }
  0xb2   :  { %v88_v34 = vsub.f32 %v86_v33, %v87_v32 }
  0xb4   :  { %v90_v35 = vadd.f32 1e-05, %v88_v34 }
  0xb6   :  { %266 = vrsqrt.f32 %v90_v35 }
  0xc0   :  { %v267_v37 = vpop.eup %266 }
  0xc1   :  { %v92_v38 = vmul.f32 %v267_v37, %v89_v36 }
  0xc3   :  { %98 = vperm.xlu0 %262, %v92_v38   ;;  %v94_v40 = vmul.f32 %v92_v38, %v85_v30 }
  0xc5   :  { %v95_v41 = vsub.f32 %v93_v39, %v94_v40 }
  0xc7   :  { %112 = vperm.xlu1 %263, %v95_v41  }
 0x142   :  { %v99_v48 = vpop.permute.xlu0 %98 }
 0x143   :  { %v106_v49 = vrot.slane %v99_v48, %v105_v47 }
 0x145   :  { %v108_v51 = vmul.f32 %v106_v49, %v42_v0  ;;  %v109_v52 = vmul.f32 %v106_v49, %v43_v1  ;;  %v147_v0 = vld [vmem:[%s412_s3] sm:$0x3]  ;;  %v321_v1 = vmov 0.0  }
 0x146   :  { %v113_v50 = vpop.permute.xlu1 %112  ;;  %248 = vmatprep.subr.bf16.mxu0 %v321_v1  ;;  %v171_v4 = vsel %vm169_vm1, %v147_v0, 0  ;;  %41 = vst.msk [vmem:[#allocation5] sm:$0x3] %vm40_vm2, %v321_v1  ;;  %250 = vmatprep.mubr.msk.bf16.mxu0 %vm322_vm3, %v321_v1 }
 0x147   :  { %v120_v53 = vrot.slane %v113_v50, %v105_v47  ;;  %249 = vmatpush3.bf16.msra.mxu0 %v171_v4 }
 0x149   :  { %v122_v54 = vadd.f32 %v120_v53, %v108_v51  ;;  %v123_v55 = vadd.f32 %v120_v53, %v109_v52 }
 0x14b   :  { %v124_v56 = vmax.f32 %v122_v54, 0.0  ;;  %v125_v57 = vmax.f32 %v123_v55, 0.0 }
 0x14d   :  { %v129_v58 = vcombine.high %v125_v57, %v125_v57  ;;  %v128_v59 = vcombine.high %v124_v56, %v124_v56  ;;  %v137_v60 = vsel %vm50_vm0, %v125_v57, 0.0  ;;  %v132_v62 = vsel %vm50_vm0, %v124_v56, 0.0  ;;  %v144_v19 = vld [vmem:[#allocation5] sm:$0x3] }
 0x14f   :  { %v138_v61 = vsel %vm50_vm0, %v129_v58, 0.0  ;;  %v133_v63 = vsel %vm50_vm0, %v128_v59, 0.0 }
 0x150   :  { %v139_v2 = vadd.f32 %v138_v61, %v137_v60  ;;  %v134_v3 = vadd.f32 %v133_v63, %v132_v62 }
 0x152   :  { %140 = vadd.xlane.f32.xlu0 %v139_v2  ;;  %135 = vadd.xlane.f32.xlu1 %v134_v3 }
 0x1df   :  { %v141_v6 = vpop.xlane.xlu0 %140  ;;  %v136_v7 = vpop.xlane.xlu1 %135 }
 0x1e0   :  { %v143_v8 = vmul.f32 0.00390625, %v141_v6  ;;  %v142_v9 = vmul.f32 0.00390625, %v136_v7 }
 0x1e2   :  { %v146_v11 = vpack.c.bf16 %v143_v8, %v143_v8  ;;  %v145_v12 = vpack.c.bf16 %v142_v9, %v142_v9 }
 0x1e4   :  { %v151_v13 = vunpack.c.l.b16 %v146_v11  ;;  %v150_v14 = vunpack.c.l.b16 %v145_v12 }
 0x1e6   :  { %v161_v15 = vrot.slane %v151_v13, %v156_v10  ;;  %v157_v16 = vrot.slane %v150_v14, %v156_v10 }
 0x1e8   :  { %v163_v17 = vsel %vm162_vm4, %v161_v15, %v157_v16 }
 0x1e9   :  { %v164_v18 = vpack.c.b16 %v163_v17, %v163_v17 }
 0x1eb   :  { %251 = vmatmul.mubr.msk.bf16.vlgmr.msra.gmra.mrb[0].mxu0 %vm165_vm5, %v164_v18 }
 0x2be   :  { %v207_v20 = vpop.f32.mrb[0].mxu0 }
 0x2bf   :  { %v213_v21 = vadd.f32 %v207_v20, %v144_v19  ;;  %v252_v22 = vpop.f32.mrb[1].mxu0 }
 0x2c0   :  { %v210_v23 = vpop.f32.mrb[2].mxu0 }
 0x2c1   :  { %215 = vst.msk [vmem:[#allocation5] sm:$0x3] %vm40_vm2, %v213_v21  ;;  %v253_v24 = vpop.f32.mrb[3].mxu0 }
 0x2c8   :  { %v219_v26 = vld [vmem:[#allocation5] sm:$0x3] }
 0x2c9   :  { %v227_v27 = vadd.f32 %v245_v25, %v219_v26 }
 0x2cb   :  { %228 = vst.msk [vmem:[#allocation5] sm:$0x3] %vm40_vm2, %v227_v27 }
 0x2cc   :  { %301 = shalt.err (!%p298_p12)
}
 0x2cd   :  { %s302_s16 = scalar_lea.hbm %s414_s5, 32 }
 0x2ce   :  { %p303_p13 = scmp.ne.s32.totalorder %s414_s5, %s302_s16  ;;  %p306_p0 = scmp.lt.u32.totalorder %s302_s16, %s414_s5 }
 0x2d0   :  { %p308_p1 = pnand %p306_p0, %p303_p13 }
 0x2d2   :  { %311 = shalt.err (!%p308_p1)
}
 0x2d3   :  { %238 = dma.vmem_to_hbm [thread:$0]  %s236_s12, 32, %s414_s5, [#allocation4]  }
 0x2d4   :  { %314 = dma.done.wait [#allocation4], 32  }
 0x2d5   :  { %315 = vsyncadd [#allocation4], 4294967264 }
 0x2d6   :  { %242 = vsyncpa [#allocation3], 1 }
 0x2d7   :  { %243 = vsyncpa [#allocation4], 1 }

</bundles_post_ra>
